<compile_context>
chip_gen: v6e
topology: v6e:2x2x1
jax: 0.10.0
libtpu: 0.0.40
codegen_flags: <defaults>
</compile_context>

<pallas_src>
import jax
import jax.numpy as jnp
from jax.experimental import pallas as pl
from jax.experimental.pallas import tpu as pltpu


# ---------------------------------------------------------------------------
# Kernels
# ---------------------------------------------------------------------------

def _scalar_convt_relu_kernel(w_ref, b_ref, x_ref, o_ref):
    """Cin == Cout == 1 path: pure VPU y = relu(w * x + b) on lane-dense tiles.

    w_ref, b_ref: (1,) f32 scalars in SMEM.
    x_ref, o_ref: (TILE_R, W) tiles in VMEM (W on the lane axis).
    """
    w = w_ref[0]
    b = b_ref[0]
    y = x_ref[...].astype(jnp.float32) * w + b
    o_ref[...] = jnp.maximum(y, 0.0).astype(o_ref.dtype)


def _pointwise_convt_relu_kernel(w_ref, b_ref, x_ref, o_ref):
    """General pointwise (1x1) path, lane-dense over flattened spatial M.

    w_ref: (Cout, Cin)   b_ref: (Cout, 1)
    x_ref: (1, Cin, TILE_M)   o_ref: (1, Cout, TILE_M)
    """
    y = jnp.dot(w_ref[...], x_ref[0], preferred_element_type=jnp.float32)
    y = y + b_ref[...]                       # (Cout, 1) broadcasts over lanes
    o_ref[0] = jnp.maximum(y, 0.0).astype(o_ref.dtype)


# ---------------------------------------------------------------------------
# Tiling heuristics (sized so double-buffered in+out tiles stay far below the
# 32 MiB scoped-VMEM default on every generation, incl. v7x's 64 MiB VMEM).
# ---------------------------------------------------------------------------

def _choose_row_tile(rows, row_bytes):
    budget = 8 * 1024 * 1024                       # bytes for ~4 live tiles
    max_rows = max(8, budget // max(4 * row_bytes, 1))
    if rows <= max_rows:
        return rows                                # full dim is always legal
    return max(8, (max_rows // 8) * 8)             # multiple-of-8 sublane tile


def _choose_m_tile(m, cin, cout):
    budget = 8 * 1024 * 1024
    per_col = 4 * (cin + cout) * 2                 # double-buffered in + out
    t = max(128, (budget // per_col) // 128 * 128)
    return m if m <= t else t                      # full dim or 128-multiple


# ---------------------------------------------------------------------------
# Wrapper
# ---------------------------------------------------------------------------

def conv_transpose2d_k1_relu(x, weight, bias, *, stride=1, padding=0, dilation=1):
    """x: (N, Cin, H, W) NCHW; weight: (Cin, Cout, 1, 1); bias: (Cout,)."""
    assert weight.shape[2] == 1 and weight.shape[3] == 1, "kernel_size must be 1"
    assert stride == 1, "only stride=1 supported"
    # dilation has no effect for a 1x1 kernel.

    n, cin, h, w = x.shape
    cout = weight.shape[1]
    ho, wo = h - 2 * padding, w - 2 * padding
    assert ho > 0 and wo > 0, "padding too large for input"

    # Crop `padding` pixels off every border (ConvTranspose2d k=1/s=1 semantics).
    xc = x[:, :, padding:h - padding, padding:w - padding]        # (N,Cin,Ho,Wo)

    if cin == 1 and cout == 1:
        # -------- spec case: pure VPU elementwise, no matmul at all ---------
        rows = n * ho
        x2d = xc.reshape(rows, wo)                 # contiguous: free reshape
        tile_r = _choose_row_tile(rows, wo * x.dtype.itemsize)
        grid = (pl.cdiv(rows, tile_r),)

        w_s = weight.reshape(1).astype(jnp.float32)
        b_s = bias.reshape(1).astype(jnp.float32)

        cost = pl.CostEstimate(
            flops=2 * rows * wo,
            transcendentals=0,
            bytes_accessed=2 * rows * wo * x.dtype.itemsize + 8,
        )

        out2d = pl.pallas_call(
            _scalar_convt_relu_kernel,
            out_shape=jax.ShapeDtypeStruct((rows, wo), x.dtype),
            grid=grid,
            in_specs=[
                pl.BlockSpec(memory_space=pltpu.MemorySpace.SMEM),   # w scalar
                pl.BlockSpec(memory_space=pltpu.MemorySpace.SMEM),   # b scalar
                pl.BlockSpec((tile_r, wo), lambda i: (i, 0)),
            ],
            out_specs=pl.BlockSpec((tile_r, wo), lambda i: (i, 0)),
            compiler_params=pltpu.CompilerParams(
                dimension_semantics=("parallel",),
                vmem_limit_bytes=32 * 1024 * 1024,
            ),
            cost_estimate=cost,
        )(w_s, b_s, x2d)
        return out2d.reshape(n, cout, ho, wo)

    # -------- general pointwise path: lane-dense (Cout, M) = W @ X ----------
    m = ho * wo
    x3d = xc.reshape(n, cin, m)                    # contiguous: free reshape
    tile_m = _choose_m_tile(m, cin, cout)
    grid = (n, pl.cdiv(m, tile_m))

    w2 = jnp.transpose(weight[:, :, 0, 0])         # (Cout, Cin), tiny
    b2 = bias.reshape(cout, 1).astype(jnp.float32)

    cost = pl.CostEstimate(
        flops=2 * n * m * cin * cout,
        transcendentals=0,
        bytes_accessed=(n * m * (cin + cout) + cin * cout + cout)
        * x.dtype.itemsize,
    )

    out3d = pl.pallas_call(
        _pointwise_convt_relu_kernel,
        out_shape=jax.ShapeDtypeStruct((n, cout, m), x.dtype),
        grid=grid,
        in_specs=[
            pl.BlockSpec((cout, cin), lambda i, j: (0, 0)),
            pl.BlockSpec((cout, 1), lambda i, j: (0, 0)),
            pl.BlockSpec((1, cin, tile_m), lambda i, j: (i, 0, j)),
        ],
        out_specs=pl.BlockSpec((1, cout, tile_m), lambda i, j: (i, 0, j)),
        compiler_params=pltpu.CompilerParams(
            dimension_semantics=("parallel", "parallel"),
            vmem_limit_bytes=32 * 1024 * 1024,
        ),
        cost_estimate=cost,
    )(w2, b2, x3d)
    return out3d.reshape(n, cout, ho, wo)


# ---------------------------------------------------------------------------
# Module mirror
# ---------------------------------------------------------------------------

class M1Pallas:
    """Mirror of the PyTorch M1 module (ConvTranspose2d -> ReLU)."""

    def __init__(self, in_channels, out_channels, kernel_size, stride, padding,
                 bias, dilation, key):
        assert kernel_size == 1
        self.stride = stride
        self.padding = padding
        self.dilation = dilation
        kw, kb = jax.random.split(key)
        # PyTorch ConvTranspose2d weight shape: (in_channels, out_channels, kH, kW)
        fan = in_channels * kernel_size * kernel_size
        bound = 1.0 / (fan ** 0.5)
        self.weight = jax.random.uniform(
            kw, (in_channels, out_channels, kernel_size, kernel_size),
            minval=-bound, maxval=bound, dtype=jnp.float32)
        if bias:
            self.bias = jax.random.uniform(
                kb, (out_channels,), minval=-bound, maxval=bound,
                dtype=jnp.float32)
        else:
            self.bias = jnp.zeros((out_channels,), dtype=jnp.float32)

    def __call__(self, x):
        return conv_transpose2d_k1_relu(
            x, self.weight, self.bias,
            stride=self.stride, padding=self.padding, dilation=self.dilation)


if __name__ == "__main__":
    # Module constants from the source script:
    in_channels, out_channels, kernel_size, stride, padding = 1, 1, 1, 1, 1
    bias, dilation = True, 1

    key = jax.random.PRNGKey(0)
    k_in, k_mod, k_in2, k_mod2 = jax.random.split(key, 4)

    # --- spec case: Cin = Cout = 1 (VPU elementwise path) --------------------
    x = jax.random.normal(k_in, (2, in_channels, 16, 16), dtype=jnp.float32)
    model = M1Pallas(in_channels, out_channels, kernel_size, stride, padding,
                     bias, dilation, k_mod)
    out = jax.block_until_ready(model(x))

    xr = x[:, :, padding:-padding, padding:-padding]
    ref = jnp.maximum(xr * model.weight[0, 0, 0, 0]
                      + model.bias[0], 0.0)                    # exact f32 ref
    assert out.shape == (2, out_channels, 14, 14), out.shape
    assert jnp.allclose(out, ref, atol=1e-5, rtol=1e-5), "mismatch (1-channel)"

    # --- multi-channel case exercising the lane-dense matmul path -----------
    xg = jax.random.normal(k_in2, (2, 4, 16, 16), dtype=jnp.float32)
    model_g = M1Pallas(4, 4, 1, 1, 1, True, 1, k_mod2)
    out_g = jax.block_until_ready(model_g(xg))

    xgr = xg[:, :, 1:-1, 1:-1]
    ref_g = jnp.einsum('nchw,co->nohw', xgr, model_g.weight[:, :, 0, 0]) \
            + model_g.bias[None, :, None, None]
    ref_g = jnp.maximum(ref_g, 0.0)
    assert out_g.shape == (2, 4, 14, 14), out_g.shape
    # Loose tolerance: MXU default matmul precision may differ from XLA einsum.
    assert jnp.allclose(out_g, ref_g, atol=1e-2, rtol=1e-2), "mismatch (4-channel)"

    print("KERNEL_OK")
</pallas_src>

<mosaic_0001>
module attributes {stable_mosaic.version = 11 : i64} {
  func.func @_scalar_convt_relu_kernel(%arg0: i32, %arg1: memref<1xf32, #tpu.memory_space<smem>>, %arg2: memref<1xf32, #tpu.memory_space<smem>>, %arg3: memref<28x14xf32, #tpu.memory_space<vmem>>, %arg4: memref<28x14xf32, #tpu.memory_space<vmem>>) attributes {dimension_semantics = [#tpu.dimension_semantics<parallel>], iteration_bounds = array<i64: 1>, scalar_prefetch = 0 : i64, scratch_operands = 0 : i64, tpu.core_type = #tpu.core_type<tc>, window_params = [{transform_indices = @transform_0, window_bounds = array<i64: 1>}, {transform_indices = @transform_1, window_bounds = array<i64: 1>}, {transform_indices = @transform_2, window_bounds = array<i64: 28, 14>}, {transform_indices = @transform_3, window_bounds = array<i64: 28, 14>}]} {
    %c0 = arith.constant 0 : index
    %0 = memref.load %arg1[%c0] : memref<1xf32, #tpu.memory_space<smem>>
    %c0_0 = arith.constant 0 : index
    %1 = memref.load %arg2[%c0_0] : memref<1xf32, #tpu.memory_space<smem>>
    %c0_1 = arith.constant 0 : index
    %c0_2 = arith.constant 0 : index
    %2 = vector.load %arg3[%c0_1, %c0_2] : memref<28x14xf32, #tpu.memory_space<vmem>>, vector<28x14xf32>
    %3 = vector.broadcast %0 : f32 to vector<28x14xf32>
    %4 = arith.mulf %2, %3 : vector<28x14xf32>
    %5 = vector.broadcast %1 : f32 to vector<28x14xf32>
    %6 = arith.addf %4, %5 : vector<28x14xf32>
    %cst = arith.constant 0.000000e+00 : f32
    %7 = vector.broadcast %cst : f32 to vector<28x14xf32>
    %8 = arith.maximumf %6, %7 : vector<28x14xf32>
    %c0_3 = arith.constant 0 : index
    %c0_4 = arith.constant 0 : index
    %9 = vector.load %arg4[%c0_3, %c0_4] : memref<28x14xf32, #tpu.memory_space<vmem>>, vector<28x14xf32>
    tpu.vector_store %arg4[%c0_3, %c0_4], %8 {strides = array<i32>} : memref<28x14xf32, #tpu.memory_space<vmem>>, vector<28x14xf32>,
    return
  }
  func.func @transform_0(%arg0: i32) -> i32 {
    %c0_i32 = arith.constant 0 : i32
    %c0_i32_0 = arith.constant 0 : i32
    return %c0_i32 : i32
  }
  func.func @transform_1(%arg0: i32) -> i32 {
    %c0_i32 = arith.constant 0 : i32
    %c0_i32_0 = arith.constant 0 : i32
    return %c0_i32 : i32
  }
  func.func @transform_2(%arg0: i32) -> (i32, i32) {
    %c0_i32 = arith.constant 0 : i32
    %c0_i32_0 = arith.constant 0 : i32
    return %arg0, %c0_i32 : i32, i32
  }
  func.func @transform_3(%arg0: i32) -> (i32, i32) {
    %c0_i32 = arith.constant 0 : i32
    %c0_i32_0 = arith.constant 0 : i32
    return %arg0, %c0_i32 : i32, i32
  }
}

</mosaic_0001>

<bundles_post_ra>
// kernel: tpu_custom_call.1
= control target key start
LH: loop header
LB: loop body
LE: loop exit
PB: predicated region body
PF: predicated region fallthrough
CT: control target
= control target key end

     0   :  { %vm36_vm0 = vcmask 113664   ;;  %vm40_vm1 = vcmask 109568   ;;  %s96_s0 = inlined_call_operand.<no memory space> [shape: f32[1], index: 0, kind: input, shape index: {}]   ;;  %s97_s1 = inlined_call_operand.<no memory space> [shape: f32[1], index: 1, kind: input, shape index: {}]   ;;  %s98_s2 = inlined_call_operand.vmem [shape: f32[28,14], index: 2, kind: input, shape index: {}]   ;;  %s99_s3 = inlined_call_operand.vmem [shape: f32[28,14], index: 3, kind: output, shape index: {}]  }
   0x1   :  { %v18_v0 = vld [vmem:[%s98_s2] sm:$0xff]  ;;  %v22_v1 = vstv %s96_s0  ;;  %v27_v2 = vstv %s97_s1  ;;  %v19_v3 = vld [vmem:[%s98_s2 + $0x8] sm:$0xff] }
   0x2   :  { %v23_v4 = vmul.f32 %v22_v1, %v18_v0  ;;  %v24_v5 = vmul.f32 %v22_v1, %v19_v3  ;;  %v20_v6 = vld [vmem:[%s98_s2 + $0x10] sm:$0xff]  ;;  %v21_v7 = vld [vmem:[%s98_s2 + $0x18] sm:$0xf] }
   0x3   :  { %v25_v8 = vmul.f32 %v22_v1, %v20_v6  ;;  %v26_v9 = vmul.f32 %v22_v1, %v21_v7 }
   0x4   :  { %v28_v10 = vadd.f32 %v27_v2, %v23_v4  ;;  %v29_v11 = vadd.f32 %v27_v2, %v24_v5 }
   0x5   :  { %v30_v12 = vadd.f32 %v27_v2, %v25_v8  ;;  %v31_v13 = vadd.f32 %v27_v2, %v26_v9 }
   0x6   :  { %v32_v14 = vmax.f32 %v28_v10, 0.0  ;;  %v33_v15 = vmax.f32 %v29_v11, 0.0 }
   0x7   :  { %v34_v16 = vmax.f32 %v30_v12, 0.0  ;;  %v35_v17 = vmax.f32 %v31_v13, 0.0 }
   0x8   :  { %37 = vst.msk [vmem:[%s99_s3] sm:$0xff] %vm36_vm0, %v32_v14  ;;  %38 = vst.msk [vmem:[%s99_s3 + $0x8] sm:$0xff] %vm36_vm0, %v33_v15 }
   0x9   :  { %39 = vst.msk [vmem:[%s99_s3 + $0x10] sm:$0xff] %vm36_vm0, %v34_v16 }
   0xa   :  { %41 = vst.msk [vmem:[%s99_s3 + $0x18] sm:$0xf] %vm40_vm1, %v35_v17 }

</bundles_post_ra>
